<compile_context>
chip_gen: v7x
topology: tpu7x:2x2x1
jax: 0.10.0
libtpu: 0.0.40
codegen_flags: <defaults>
</compile_context>

<pallas_src>
import functools

import jax
import jax.numpy as jnp
from jax import lax
from jax.experimental import pallas as pl
from jax.experimental.pallas import tpu as pltpu

_ALIGN = 16  # row alignment (sublane tile for bf16; also fine for f32)


def _conv3x3_kernel(x_ref, t_ref, b_ref, o_ref, *, chunk):
    # x_ref: (row_block, K)       im2col'd rows, K = 3*(W+2)*Cin
    # t_ref: (K, W*Cout)          block-Toeplitz weight (VMEM-resident)
    # b_ref: (1, W*Cout)          bias tiled across W (f32)
    # o_ref: (row_block, W*Cout)  lane-dense output rows
    rows = x_ref.shape[0]
    n_chunks = rows // chunk

    def body(c, carry):
        r0 = pl.multiple_of(c * chunk, chunk)          # sublane-aligned start
        lhs = x_ref[pl.ds(r0, chunk), :]
        acc = jnp.dot(lhs, t_ref[...], preferred_element_type=jnp.float32)
        o_ref[pl.ds(r0, chunk), :] = (acc + b_ref[...]).astype(o_ref.dtype)
        return carry

    lax.fori_loop(0, n_chunks, body, 0, unroll=True)


def _build_banded_weight(weight_oihw, W):
    """(Cout, Cin, 3, 3) -> (3, (W+2)*Cin, W*Cout) block-banded matmul weight.

    T[kh, (w+kw)*Cin + ci, w*Cout + co] = weight[co, ci, kh, kw]
    """
    Cout, Cin = weight_oihw.shape[0], weight_oihw.shape[1]
    w_hwio = jnp.transpose(weight_oihw, (2, 3, 1, 0))        # (3, 3, Cin, Cout)
    wi = jnp.arange(W + 2)[:, None]                          # padded input col
    wo = jnp.arange(W)[None, :]                              # output col
    kw = wi - wo                                             # tap index
    in_band = (kw >= 0) & (kw <= 2)
    kw_idx = jnp.clip(kw, 0, 2)
    # t5[kh, wi, wo, ci, co] = w_hwio[kh, wi-wo, ci, co] inside the band else 0
    t5 = jnp.where(in_band[None, :, :, None, None], w_hwio[:, kw_idx], 0.0)
    t = jnp.transpose(t5, (0, 1, 3, 2, 4))                   # (3, W+2, Cin, W, Cout)
    return t.reshape(3, (W + 2) * Cin, W * Cout)


def _round_up(x, m):
    return ((x + m - 1) // m) * m


def conv_out_forward(x_nchw, weight_oihw, bias, *, row_block=None,
                     compute_dtype=jnp.bfloat16):
    """Equivalent of ConvOut.forward (nn.Conv2d k=3, padding=1) on NCHW input.

    compute_dtype: dtype of the MXU operands (x / weight).  bf16 (default) is
    MXU-native on v6e/v7x and halves x/T DMA+VMEM bytes; accumulation is
    always f32.  Pass jnp.float32 for bit-faithful Conv2d numerics.
    """
    N, Cin, H, W = x_nchw.shape
    Cout = weight_oihw.shape[0]
    out_dtype = x_nchw.dtype

    K0 = (W + 2) * Cin
    K = 3 * K0                 # im2col'd contraction dim (216 for the test)
    ncols = W * Cout           # lane-dense output width (128 for the test)

    # --- row tiling -----------------------------------------------------
    M = N * H
    if row_block is None:
        row_block = 512        # ~512 rows/step amortizes the ~0.35us step cost
        if M <= row_block:
            # Small problem: keep >= 2 grid steps when possible so both v7x
            # TensorCores get work (grid axis is "parallel").
            half = -(-M // 2)
            row_block = max(_ALIGN, _round_up(half, _ALIGN))
    row_block = _round_up(row_block, _ALIGN)
    M_pad = _round_up(M, row_block)

    # In-kernel chunk: bounds the live (chunk, 128) f32 matmul result so it
    # streams through the 64-vreg file instead of spilling.
    chunk = min(row_block, 256)
    while row_block % chunk != 0:
        chunk -= _ALIGN
    chunk = max(chunk, _ALIGN)

    # --- layout glue (plain JAX) -----------------------------------------
    # NCHW -> zero-padded NHWC rows -> im2col over the 3 kernel rows so the
    # kernel needs no unaligned in-kernel slicing and does ONE MXU pass.
    x_nhwc = jnp.transpose(x_nchw, (0, 2, 3, 1))             # (N, H, W, Cin)
    x_padded = jnp.pad(x_nhwc, ((0, 0), (1, 1), (1, 1), (0, 0)))
    x_rows = x_padded.reshape(N, H + 2, K0)                  # lane-dense rows
    x_im2col = jnp.concatenate(
        [x_rows[:, 0:H], x_rows[:, 1:H + 1], x_rows[:, 2:H + 2]], axis=-1)
    x_flat = x_im2col.reshape(M, K)
    if M_pad != M:
        x_flat = jnp.pad(x_flat, ((0, M_pad - M), (0, 0)))
    x_flat = x_flat.astype(compute_dtype)

    t_flat = _build_banded_weight(weight_oihw, W).reshape(K, ncols)
    t_flat = t_flat.astype(compute_dtype)
    b_tiled = jnp.tile(bias, W).reshape(1, ncols).astype(jnp.float32)

    # --- pallas call ------------------------------------------------------
    grid = (M_pad // row_block,)
    kernel = functools.partial(_conv3x3_kernel, chunk=chunk)
    out_flat = pl.pallas_call(
        kernel,
        out_shape=jax.ShapeDtypeStruct((M_pad, ncols), out_dtype),
        grid_spec=pltpu.PrefetchScalarGridSpec(
            num_scalar_prefetch=0,
            grid=grid,
            in_specs=[
                pl.BlockSpec((row_block, K), lambda i: (i, 0)),
                # constant index_maps -> weight / bias stay VMEM-resident
                pl.BlockSpec((K, ncols), lambda i: (0, 0)),
                pl.BlockSpec((1, ncols), lambda i: (0, 0)),
            ],
            out_specs=pl.BlockSpec((row_block, ncols), lambda i: (i, 0)),
        ),
        compiler_params=pltpu.CompilerParams(
            dimension_semantics=("parallel",),
            # ~1 MiB per step double-buffered; 32 MiB scoped limit is safe on
            # v5e/v6e (128 MiB VMEM) and v7x (64 MiB VMEM).
            vmem_limit_bytes=32 * 1024 * 1024,
        ),
    )(x_flat, t_flat, b_tiled)

    out = out_flat[:M].reshape(N, H, W, Cout)
    return jnp.transpose(out, (0, 3, 1, 2))                  # NHWC -> NCHW


if __name__ == "__main__":
    # Deterministic synthetic parameters and inputs (no checkpoint loading).
    in_ch, out_ch = 4, 8
    N, H, W = 2, 16, 16

    key = jax.random.PRNGKey(0)
    kx, kw_, kb = jax.random.split(key, 3)

    x = jax.random.normal(kx, (N, in_ch, H, W), dtype=jnp.float32)
    # nn.Conv2d weight shape: (out_ch, in_ch, 3, 3); bias shape: (out_ch,)
    weight = jax.random.normal(kw_, (out_ch, in_ch, 3, 3), dtype=jnp.float32) * 0.1
    bias = jax.random.normal(kb, (out_ch,), dtype=jnp.float32) * 0.1

    # Pure-JAX reference (same semantics as PyTorch Conv2d k=3, padding=1).
    ref = jax.lax.conv_general_dilated(
        x, weight,
        window_strides=(1, 1),
        padding=((1, 1), (1, 1)),
        dimension_numbers=("NCHW", "OIHW", "NCHW"),
    ) + bias.reshape(1, out_ch, 1, 1)

    # Default path: bf16 MXU operands, f32 accumulation (v6e/v7x fast path).
    # Tolerance deliberately loosened for bf16 operand rounding.
    out_bf16 = jax.block_until_ready(conv_out_forward(x, weight, bias))
    assert out_bf16.shape == (N, out_ch, H, W)
    assert jnp.allclose(out_bf16, ref, atol=5e-2, rtol=5e-2), float(
        jnp.max(jnp.abs(out_bf16 - ref)))

    # f32-operand path: matches Conv2d f32 numerics tightly.
    out_f32 = jax.block_until_ready(
        conv_out_forward(x, weight, bias, compute_dtype=jnp.float32))
    assert jnp.allclose(out_f32, ref, atol=1e-3, rtol=1e-3), float(
        jnp.max(jnp.abs(out_f32 - ref)))

    print("KERNEL_OK")
</pallas_src>

<mosaic_0001>
module attributes {stable_mosaic.version = 11 : i64} {
  func.func @_conv3x3_kernel(%arg0: i32, %arg1: memref<16x216xbf16, #tpu.memory_space<vmem>>, %arg2: memref<216x128xbf16, #tpu.memory_space<vmem>>, %arg3: memref<1x128xf32, #tpu.memory_space<vmem>>, %arg4: memref<16x128xf32, #tpu.memory_space<vmem>>) attributes {dimension_semantics = [#tpu.dimension_semantics<parallel>], iteration_bounds = array<i64: 2>, scalar_prefetch = 0 : i64, scratch_operands = 0 : i64, tpu.core_type = #tpu.core_type<tc>, window_params = [{transform_indices = @transform_0, window_bounds = array<i64: 16, 216>}, {pipeline_mode = #tpu.pipeline_mode<synchronous>, transform_indices = @transform_1, window_bounds = array<i64: 216, 128>}, {pipeline_mode = #tpu.pipeline_mode<synchronous>, transform_indices = @transform_2, window_bounds = array<i64: 1, 128>}, {transform_indices = @transform_3, window_bounds = array<i64: 16, 128>}]} {
    %c0_i32 = arith.constant 0 : i32
    %c16_i32 = arith.constant 16 : i32
    %0 = arith.muli %c0_i32, %c16_i32 : i32
    %1 = tpu.assume_multiple %0, 16 : i32
    %2 = arith.index_cast %1 : i32 to index
    %c0 = arith.constant 0 : index
    %3 = vector.load %arg1[%2, %c0] : memref<16x216xbf16, #tpu.memory_space<vmem>>, vector<16x216xbf16>
    %c0_0 = arith.constant 0 : index
    %c0_1 = arith.constant 0 : index
    %4 = vector.load %arg2[%c0_0, %c0_1] : memref<216x128xbf16, #tpu.memory_space<vmem>>, vector<216x128xbf16>
    %cst = arith.constant dense<0.000000e+00> : vector<16x128xf32>
    %5 = tpu.matmul %3, %4, %cst {dimension_numbers = #tpu.dot_dimension_numbers<[1], [0], [0], [1], [0, 0, 1, 1], [], []>} : vector<16x216xbf16>, vector<216x128xbf16>, vector<16x128xf32> -> vector<16x128xf32>
    %c0_2 = arith.constant 0 : index
    %c0_3 = arith.constant 0 : index
    %6 = vector.load %arg3[%c0_2, %c0_3] : memref<1x128xf32, #tpu.memory_space<vmem>>, vector<1x128xf32>
    %7 = vector.broadcast %6 : vector<1x128xf32> to vector<16x128xf32>
    %8 = arith.addf %5, %7 : vector<16x128xf32>
    %9 = arith.index_cast %1 : i32 to index
    %c0_4 = arith.constant 0 : index
    %10 = vector.load %arg4[%9, %c0_4] : memref<16x128xf32, #tpu.memory_space<vmem>>, vector<16x128xf32>
    tpu.vector_store %arg4[%9, %c0_4], %8 {strides = array<i32>} : memref<16x128xf32, #tpu.memory_space<vmem>>, vector<16x128xf32>,
    %c1_i32 = arith.constant 1 : i32
    return
  }
  func.func @transform_0(%arg0: i32) -> (i32, i32) {
    %c0_i32 = arith.constant 0 : i32
    %c0_i32_0 = arith.constant 0 : i32
    return %arg0, %c0_i32 : i32, i32
  }
  func.func @transform_1(%arg0: i32) -> (i32, i32) {
    %c0_i32 = arith.constant 0 : i32
    %c0_i32_0 = arith.constant 0 : i32
    %c0_i32_1 = arith.constant 0 : i32
    return %c0_i32, %c0_i32_0 : i32, i32
  }
  func.func @transform_2(%arg0: i32) -> (i32, i32) {
    %c0_i32 = arith.constant 0 : i32
    %c0_i32_0 = arith.constant 0 : i32
    %c0_i32_1 = arith.constant 0 : i32
    return %c0_i32, %c0_i32_0 : i32, i32
  }
  func.func @transform_3(%arg0: i32) -> (i32, i32) {
    %c0_i32 = arith.constant 0 : i32
    %c0_i32_0 = arith.constant 0 : i32
    return %arg0, %c0_i32 : i32, i32
  }
}

</mosaic_0001>

<bundles_post_ra>
// kernel: tpu_custom_call.1
= control target key start
LH: loop header
LB: loop body
LE: loop exit
PB: predicated region body
PF: predicated region fallthrough
CT: control target
= control target key end

     0   :  { %8 = vsyncpa [#allocation3], 0  ;;  %s976_s0 = inlined_call_operand.hbm [shape: bf16[32,216], index: 0, kind: input, shape index: {}]   ;;  %s977_s1 = inlined_call_operand.hbm [shape: bf16[216,128], index: 1, kind: input, shape index: {}]   ;;  %s978_s2 = inlined_call_operand.vmem [shape: f32[1,128], index: 2, kind: input, shape index: {}]   ;;  %s979_s3 = inlined_call_operand.hbm [shape: f32[32,128], index: 3, kind: output, shape index: {}]  }
   0x1   :  { %10 = vsyncpa [#allocation3 + $0x1], 0 }
   0x2   :  { %11 = vsyncpa [#allocation6], 0 }
   0x3   :  { %12 = vsyncpa [#allocation4], 0 }
   0x4   :  { %14 = vsyncpa [#allocation4 + $0x1], 0  ;;  %s764_s12 = smov 0   ;;  %s766_s13 = smov 0  }
   0x5   :  { %s768_s14 = smov 0   ;;  %s770_s15 = smov 0  }
   0x6 LB: > { %s785_s16 = sadd.s32 4294967295, %s732_s15   ;;  %s485_s17 = sadd.s32 4294967294, %s732_s15   ;;  %s732_s15 = sphi %s770_s15, %s999_s15   ;;  %s728_s14 = sphi %s768_s14, %s998_s14   ;;  %s724_s13 = sphi %s766_s13, %s997_s13   ;;  %s720_s12 = sphi %s764_s12, %s996_s12  }
   0x7   : > { %p40_p0 = scmp.ne.s32.totalorder %s724_s13, %s720_s12  ;;  %p980_p1 = scmp.eq.s32.totalorder %s785_s16, 0 }
   0x8   : > { %p112_p3 = scmp.eq.s32.totalorder %s485_s17, 1  ;;  %p486_p5 = scmp.ge.s32.totalorder %s732_s15, 1 }
   0x9   : > { %p794_p4 = por %p980_p1, %p40_p0  ;;  %p119_p7 = scmp.lt.s32.totalorder %s732_s15, 3 }
   0xa   : > { %p799_p6 = por %p112_p3, %p40_p0  ;;  %s734_s21 = smov [#allocation5]  }
   0xb   : > { %s983_s18 = scalar_select %p794_p4, 1, 0 }
   0xc   : > { %s984_s19 = scalar_select %p799_p6, 1, 0 }
   0xd   : > { %p804_p8 = pnand %p486_p5, %p119_p7  ;;  %s131_s22 = sshll.u32 %s734_s21, 4  ;;  %s808_s22 = int_to_ptr.vmem [resolvable:$true] %s131_s22 }
   0xe   : > { %s820_s24 = sadd.s32 1, %s732_s15   ;;  %s27_s25 = sadd.s32 1, %s728_s14 }
   0xf   : > { %s985_s20 = scalar_select %p804_p8, 1, 0 }
  0x10   : > { %p531_p9 = pneg %p804_p8  ;;  %s24_s26 = ssub.s32 %s732_s15, %s820_s24 }
  0x11   : > { %s604_s29 = scalar_lea.hbm %s977_s1, 1728 }
  0x12   : > { %p815_p11 = pnand %p531_p9, %p980_p1  ;;  %p605_p12 = scmp.ne.s32.totalorder %s977_s1, %s604_s29 }
  0x13   : > { %p611_p5 = scmp.lt.u32.totalorder %s604_s29, %s977_s1 }
  0x14   : > { %p606_p13 = pneg %p815_p11 }
  0x16   : > { %p607_p0 = pnand %p606_p13, %p605_p12 }
  0x18   : > { %p608_p3 = pneg %p607_p0 }
  0x1a   : > { %p613_p7 = pnand %p611_p5, %p608_p3 }
  0x1c   : > { %616 = shalt.err (!%p613_p7)
}
  0x1d   : > { %s617_s7 = scalar_lea.vmem %s808_s22, 1728  ;;  %p625_p2 = scmp.lt.s32.totalorder %s808_s22, %s808_s22 }
  0x1e   : > { %p618_p9 = scmp.ne.s32.totalorder %s808_s22, %s617_s7  ;;  %p626_p6 = scmp.lt.s32.totalorder %s617_s7, %s617_s7 }
  0x20   : > { %p620_p10 = pnand %p618_p9, %p606_p13  ;;  %p627_p4 = por %p626_p6, %p625_p2 }
  0x22   : > { %p621_p1 = pneg %p620_p10 }
  0x24   : > { %p628_p8 = pnand %p627_p4, %p621_p1 }
  0x26   : > { %631 = shalt.err (!%p628_p8)
}
  0x27   : > { %s735_s8 = smov 64   ;;  %s736_s9 = smov 4  }
  0x28   : > { %534 = dma.hbm_to_vmem [thread:$0]  (!%p815_p11), %s977_s1, 1728, %s808_s22, [#allocation6], %s735_s8, %s735_s8, %s736_s9  }
  0x29   : > { %p25_p2 = scmp.eq.s32.totalorder %s24_s26, 0  ;;  %p34_p1 = scmp.ne.s32.totalorder %s728_s14, %s724_s13 }
  0x2a   : > { %p35_p4 = scmp.eq.s32.totalorder %s732_s15, 0  ;;  %p544_p6 = scmp.lt.s32.totalorder %s732_s15, 2 }
  0x2b   : > { %s851_s17 = scalar_select %p25_p2, %s728_s14, %s27_s25  }
  0x2c   : > { %p36_p8 = por %p35_p4, %p34_p1  ;;  %p987_p10 = scmp.eq.s32.totalorder %s785_s16, 1 }
  0x2d   : > { %s148_s27 = sand.u32 1, %s728_s14   ;;  %s521_s28 = sshll.u32 %s732_s15, 8 }
  0x2e   : > { %p855_p12 = por %p987_p10, %p34_p1  ;;  %s489_s29 = sshll.u32 %s148_s27, 4 }
  0x2f   : > { %s864_s4 = scalar_lea.hbm %s976_s0, %s521_s28  ;;  %s152_s22 = scalar_lea.vmem [#allocation2], %s489_s29 }
  0x30   : > { %s160_s25 = sshll.u32 %s152_s22, 4  ;;  %p866_p11 = pnand %p544_p6, %p36_p8  ;;  %s870_s25 = int_to_ptr.vmem [resolvable:$true] %s160_s25 }
  0x31   : > { %s872_s5 = scalar_lea.sflag [#allocation3], %s148_s27  ;;  %s632_s6 = scalar_lea.hbm %s864_s4, 256 }
  0x32   : > { %p633_p13 = scmp.ne.s32.totalorder %s864_s4, %s632_s6  ;;  %p634_p0 = pneg %p866_p11 }
  0x33   : > { %s637_s9 = scalar_lea.hbm %s976_s0, 512  ;;  %p638_p7 = scmp.lt.u32.totalorder %s864_s4, %s976_s0 }
  0x34   : > { %p635_p3 = pnand %p634_p0, %p633_p13  ;;  %p639_p9 = scmp.lt.u32.totalorder %s637_s9, %s632_s6 }
  0x35   : > { %p641_p1 = scmp.lt.u32.totalorder %s632_s6, %s864_s4 }
  0x36   : > { %p636_p5 = pneg %p635_p3  ;;  %p640_p2 = por %p639_p9, %p638_p7 }
  0x38   : > { %p642_p4 = por %p641_p1, %p640_p2 }
  0x3a   : > { %p643_p6 = pnand %p642_p4, %p636_p5 }
  0x3c   : > { %646 = shalt.err (!%p643_p6)
}
  0x3d   : > { %s647_s27 = scalar_lea.vmem %s870_s25, 256  ;;  %s737_s28 = smov [#allocation2]  }
  0x3e   : > { %p648_p8 = scmp.ne.s32.totalorder %s870_s25, %s647_s27  ;;  %s652_s29 = sshll.u32 %s737_s28, 4  ;;  %s653_s29 = int_to_ptr.vmem [resolvable:$false] %s652_s29 }
  0x3f   : > { %s654_s23 = scalar_lea.vmem %s653_s29, 512  ;;  %p655_p3 = scmp.lt.s32.totalorder %s870_s25, %s653_s29 }
  0x40   : > { %p650_p10 = pnand %p648_p8, %p634_p0  ;;  %p656_p7 = scmp.lt.s32.totalorder %s654_s23, %s647_s27 }
  0x42   : > { %p651_p13 = pneg %p650_p10  ;;  %p657_p9 = por %p656_p7, %p655_p3 }
  0x44   : > { %p658_p2 = pnand %p657_p9, %p651_p13 }
  0x46   : > { %661 = shalt.err (!%p658_p2)
}
  0x47   : > { %s738_s30 = smov 128   ;;  %s739_s22 = smov 8  }
  0x48   : > { %538 = dma.hbm_to_vmem [thread:$0]  (!%p866_p11), %s864_s4, 256, %s870_s25, %s872_s5, %s738_s30, %s738_s30, %s739_s22  }
  0x49   : > { %p990_p0 = scmp.ne.s32.totalorder %s985_s20, 0 }
  0x4a   : > { %s903_s6 = sand.u32 (!%p990_p0), 1, %s724_s13   ;;  %p991_p5 = scmp.ne.s32.totalorder (!%p990_p0), %s983_s18, 0 }
  0x4b   : > { %172 = sbr.rel (%p990_p0) target bundleno = 374 (0x176), region = 32  ;;  %s494_s7 = sshll.u32 (!%p990_p0), %s903_s6, 4 }
  0x4c   : > { %s175_s8 = scalar_lea.sflag (!%p990_p0), [#allocation3], %s903_s6  ;;  %s909_s9 = scalar_lea.vmem (!%p990_p0), [#allocation2], %s494_s7 }
  0x52   : > { %707 = dma.done.wait (%p991_p5), %s175_s8, 256  }
  0x53   : > { %709 = vsyncadd (%p991_p5), %s175_s8, 4294967040  ;;  %p992_p11 = scmp.eq.s32.totalorder %s785_s16, 0 }
  0x55   : > { %711 = dma.done.wait (%p992_p11), [#allocation6], 1728   ;;  %p993_p1 = pmov %p992_p11 }
  0x56   : > { %v740_v0 = vmov 0   ;;  %v587_v1 = vld [vmem:[#allocation5] sm:$0xff]   ;;  %v588_v2 = vld [vmem:[#allocation5 + $0x8] sm:$0xff]   ;;  %v589_v3 = vld [vmem:[#allocation5 + $0x10] sm:$0xff]   ;;  %vm337_vm0 = vcmask 719872   ;;  %vm341_vm1 = vcmask 1043456  }
  0x57   : > { %713 = vsyncadd (%p993_p1), [#allocation6], 4294965568  ;;  %345 = vmatprep.subr.bf16.mxu0 %v740_v0  ;;  %v590_v4 = vld [vmem:[#allocation5 + $0x18] sm:$0xff]   ;;  %v591_v5 = vld [vmem:[#allocation5 + $0x20] sm:$0xff]   ;;  %s204_s4 = scalar_lea.vmem [#allocation7], %s494_s7  ;;  %s522_s26 = sshll.u32 %s785_s16, 8 }
  0x58   : > { %346 = vmatpush1.bf16.msra.mxu0 %v587_v1  ;;  %v603_v6 = vld [vmem:[%s909_s9 + $0x4] ss:$8 sps:$4 sm:$0xff]   ;;  %v600_v15 = vld [vmem:[#allocation5 + $0x68] ss:$0 sps:$4 sm:$0xff]   ;;  %v497_v18 = vld [vmem:[%s978_s2] ss:$0 sm:$0xff]  ;;  %s932_s11 = scalar_lea.hbm %s979_s3, %s522_s26 }
  0x59   : > { %347 = vmatprep.subr.bf16.mxu0 %v740_v0  ;;  %514 = vmatprep.mubr.msk.bf16.mxu0 %vm337_vm0, %v603_v6  ;;  %v592_v7 = vld [vmem:[#allocation5 + $0x28] sm:$0xff]   ;;  %v593_v8 = vld [vmem:[#allocation5 + $0x30] sm:$0xff]   ;;  %v594_v9 = vld [vmem:[#allocation5 + $0x38] sm:$0xff]   ;;  %v343_v16 = vsel %vm341_vm1, %v600_v15, 0  ;;  %s402_s25 = sshll.u32 %s204_s4, 4  ;;  %s389_s27 = scalar_lea.sflag [#allocation4], %s903_s6  ;;  %s927_s25 = int_to_ptr.vmem [resolvable:$true] %s402_s25 }
  0x5a   : > { %v595_v10 = vld [vmem:[#allocation5 + $0x40] sm:$0xff]   ;;  %v596_v11 = vld [vmem:[#allocation5 + $0x48] sm:$0xff]   ;;  %v597_v12 = vld [vmem:[#allocation5 + $0x50] sm:$0xff]   ;;  %s662_s16 = scalar_lea.vmem %s927_s25, 256  ;;  %s741_s28 = smov [#allocation7]  }
  0x5b   : > { %v598_v13 = vld [vmem:[#allocation5 + $0x58] sm:$0xff]   ;;  %v599_v14 = vld [vmem:[#allocation5 + $0x60] sm:$0xff]   ;;  %p663_p4 = scmp.ne.s32.totalorder %s927_s25, %s662_s16  ;;  %s666_s29 = sshll.u32 %s741_s28, 4  ;;  %s667_s29 = int_to_ptr.vmem [resolvable:$false] %s666_s29 }
  0x5c   : > { %348 = vmatpush1.bf16.msra.mxu0 %v588_v2  ;;  %v601_v17 = vld [vmem:[%s909_s9] ss:$8 sps:$4 sm:$0xff]   ;;  %s668_s23 = scalar_lea.vmem %s667_s29, 512  ;;  %p669_p10 = scmp.lt.s32.totalorder %s927_s25, %s667_s29 }
  0x5d   : > { %349 = vmatprep.subr.bf16.mxu0 %v740_v0  ;;  %p664_p6 = pnand %p663_p4, %p855_p12  ;;  %p670_p13 = scmp.lt.s32.totalorder %s668_s23, %s662_s16 }
  0x5f   : > { %p665_p8 = pneg %p664_p6  ;;  %p671_p3 = por %p670_p13, %p669_p10 }
  0x60   : > { %350 = vmatpush1.bf16.msra.mxu0 %v589_v3 }
  0x61   : > { %351 = vmatprep.subr.bf16.mxu0 %v740_v0  ;;  %p672_p7 = pnand %p671_p3, %p665_p8 }
  0x64   : > { %352 = vmatpush1.bf16.msra.mxu0 %v590_v4 }
  0x65   : > { %353 = vmatprep.subr.bf16.mxu0 %v740_v0 }
  0x68   : > { %354 = vmatpush1.bf16.msra.mxu0 %v591_v5 }
  0x69   : > { %355 = vmatprep.subr.bf16.mxu0 %v740_v0 }
  0x6c   : > { %356 = vmatpush1.bf16.msra.mxu0 %v592_v7 }
  0x6d   : > { %357 = vmatprep.subr.bf16.mxu0 %v740_v0 }
  0x70   : > { %358 = vmatpush1.bf16.msra.mxu0 %v593_v8 }
  0x71   : > { %359 = vmatprep.subr.bf16.mxu0 %v740_v0 }
  0x74   : > { %360 = vmatpush1.bf16.msra.mxu0 %v594_v9 }
  0x75   : > { %361 = vmatprep.subr.bf16.mxu0 %v740_v0 }
  0x78   : > { %362 = vmatpush1.bf16.msra.mxu0 %v595_v10 }
  0x79   : > { %363 = vmatprep.subr.bf16.mxu0 %v740_v0 }
  0x7c   : > { %364 = vmatpush1.bf16.msra.mxu0 %v596_v11 }
  0x7d   : > { %365 = vmatprep.subr.bf16.mxu0 %v740_v0 }
  0x80   : > { %366 = vmatpush1.bf16.msra.mxu0 %v597_v12 }
  0x81   : > { %367 = vmatprep.subr.bf16.mxu0 %v740_v0 }
  0x84   : > { %368 = vmatpush1.bf16.msra.mxu0 %v598_v13 }
  0x85   : > { %369 = vmatprep.subr.bf16.mxu0 %v740_v0 }
  0x88   : > { %370 = vmatpush1.bf16.msra.mxu0 %v599_v14 }
  0x89   : > { %371 = vmatprep.subr.bf16.mxu0 %v740_v0 }
  0x8c   : > { %372 = vmatpush1.bf16.msra.mxu0 %v343_v16 }
  0x8f   : > { %378 = vmatmul.mubr.bf16.vlgmr.msra.gmra.mrb[0].mxu0 %v601_v17 }
 0x162   : > { %v379_v19 = vpop.f32.mrb[0].mxu0 }
 0x163   : > { %v380_v20 = vadd.f32 %v497_v18, %v379_v19  ;;  %v381_v21 = vpop.f32.mrb[1].mxu0 }
 0x164   : > { %v382_v22 = vpop.f32.mrb[2].mxu0 }
 0x165   : > { %386 = vst [vmem:[%s204_s4] sm:$0xff] %v380_v20  ;;  %v383_v23 = vadd.f32 %v497_v18, %v382_v22  ;;  %v384_v24 = vpop.f32.mrb[3].mxu0 }
 0x167   : > { %387 = vst [vmem:[%s204_s4 + $0x8] sm:$0xff] %v383_v23 }
 0x168   : > { %675 = shalt.err (!%p672_p7)
}
 0x169   : > { %s676_s30 = scalar_lea.hbm %s932_s11, 256  ;;  %s680_s8 = scalar_lea.hbm %s979_s3, 512 }
 0x16a   : > { %p677_p9 = scmp.ne.s32.totalorder %s932_s11, %s676_s30  ;;  %p681_p5 = scmp.lt.u32.totalorder %s932_s11, %s979_s3 }
 0x16b   : > { %p682_p11 = scmp.lt.u32.totalorder %s680_s8, %s676_s30  ;;  %p684_p4 = scmp.lt.u32.totalorder %s676_s30, %s932_s11 }
 0x16c   : > { %p678_p2 = pnand %p677_p9, %p855_p12 }
 0x16d   : > { %p683_p1 = por %p682_p11, %p681_p5 }
 0x16e   : > { %p679_p0 = pneg %p678_p2 }
 0x16f   : > { %p685_p6 = por %p684_p4, %p683_p1 }
 0x171   : > { %p686_p8 = pnand %p685_p6, %p679_p0 }
 0x173   : > { %689 = shalt.err (!%p686_p8)
}
 0x174   : > { %s742_s20 = smov 128   ;;  %s743_s4 = smov 8  }
 0x175   : > { %529 = dma.vmem_to_hbm [thread:$0]  (%p855_p12), %s927_s25, 256, %s932_s11, %s389_s27, %s742_s20, %s742_s20, %s743_s4  }
 0x176 PF: > { %s417_s26 = sand.u32 1, %s720_s12   ;;  %p994_p10 = scmp.ne.s32.totalorder %s984_s19, 0 }
 0x177   : > { %p995_p13 = scmp.ge.s32.totalorder %s732_s15, 2  ;;  %s418_s5 = scalar_lea.sflag [#allocation4], %s417_s26 }
 0x179   : > { %p540_p3 = pnand %p995_p13, %p994_p10 }
 0x17b   : > { %715 = dma.done.wait (!%p540_p3), %s418_s5, 256  }
 0x17c   : > { %717 = vsyncadd (!%p540_p3), %s418_s5, 4294967040  ;;  %p17_p7 = scmp.ge.s32.totalorder %s820_s24, 4   ;;  %s996_s12 = smov %s724_s13 }
 0x17d   : > { %s997_s13 = smov %s728_s14  ;;  %s998_s14 = smov %s851_s17 }
 0x17e   : > { %s999_s15 = smov %s820_s24  ;;  %19 = sbr.rel (!%p17_p7) target bundleno = 6 (0x6), region = 82 }
 0x185   :  { %423 = vsyncpa [#allocation3], 1 }
 0x186   :  { %425 = vsyncpa [#allocation3 + $0x1], 1 }
 0x187   :  { %426 = vsyncpa [#allocation6], 1 }
 0x188   :  { %427 = vsyncpa [#allocation4], 1 }
 0x189   :  { %429 = vsyncpa [#allocation4 + $0x1], 1 }

</bundles_post_ra>
